<compile_context>
chip_gen: v5e
topology: v5e:2x2
jax: 0.10.0
libtpu: 0.0.40
codegen_flags: <defaults>
</compile_context>

<pallas_src>
import numpy as np
import jax
import jax.numpy as jnp
from jax.experimental import pallas as pl
from jax.experimental.pallas import tpu as pltpu

NUM_CLASSES = 2
LOGIT_LANES = 128                                   # padded fc2 / softmax width
W_SLAB_COLS = 256 + 128 + 128 + LOGIT_LANES         # conv1 | conv2 | fc1 | fc2


# --------------------------------------------------------------------------
# Fused kernel
# --------------------------------------------------------------------------
def cnn_kernel(x_ref, w_ref, b_ref, o_ref):
    """Fused SimpleCNN_softmax forward for one batch tile.

    x_ref: (TM, Cin*16)        bf16  input rows, flattened (channel, y, x)
    w_ref: (128, 640)          bf16  packed weights:
             [:Cin*16,   0:256]  conv1 as dense matrix, cols (wi, pb, oc)
             [:64,     256:384]  conv2 as dense matrix, rows (pb, ci), cols (pos, oc)
             [:32,     384:512]  fc1 weight (transposed)
             [:128,    512:640]  fc2 weight (transposed), zero-padded classes
    b_ref: (1, 640)            f32   packed biases; padded fc2 lanes = -1e30
    o_ref: (TM, 128)           f32   softmax probabilities (padded lanes ~ 0)
    """
    in_feats = x_ref.shape[1]
    x = x_ref[...]                                   # already bf16

    # conv1 (+ bias): one lane-dense matmul, bf16 operands / f32 accumulation.
    h1 = jnp.dot(x, w_ref[0:in_feats, 0:256],
                 preferred_element_type=jnp.float32) + b_ref[:, 0:256]
    h1 = jnp.maximum(h1, 0.0)                        # relu1
    # maxpool1 (2x2): columns are (window-pos wi, pool-window pb, channel oc),
    # so the pool is an elementwise max over four contiguous 64-wide slices.
    p1 = jnp.maximum(jnp.maximum(h1[:, 0:64], h1[:, 64:128]),
                     jnp.maximum(h1[:, 128:192], h1[:, 192:256]))

    # conv2 (+ bias)
    h2 = jnp.dot(p1.astype(jnp.bfloat16), w_ref[0:64, 256:384],
                 preferred_element_type=jnp.float32) + b_ref[:, 256:384]
    h2 = jnp.maximum(h2, 0.0)                        # relu2
    # maxpool2 (2x2 -> 1x1): columns are (out-position, channel).
    p2 = jnp.maximum(jnp.maximum(h2[:, 0:32], h2[:, 32:64]),
                     jnp.maximum(h2[:, 64:96], h2[:, 96:128]))

    # fc1 + relu
    f1 = jnp.dot(p2.astype(jnp.bfloat16), w_ref[0:32, 384:512],
                 preferred_element_type=jnp.float32) + b_ref[:, 384:512]
    f1 = jnp.maximum(f1, 0.0)

    # fc2, padded to 128 lanes (zero weight cols, -1e30 bias on padded lanes)
    # -> single bf16 MXU pass + lane-dense softmax + unmasked 128-wide store.
    logits = jnp.dot(f1.astype(jnp.bfloat16), w_ref[0:128, 512:640],
                     preferred_element_type=jnp.float32) + b_ref[:, 512:640]
    m = jnp.max(logits, axis=-1, keepdims=True)
    e = jnp.exp(logits - m)                          # padded lanes underflow to 0
    probs = e / jnp.sum(e, axis=-1, keepdims=True)
    o_ref[...] = probs.astype(o_ref.dtype)


# --------------------------------------------------------------------------
# Exact lowering of a 3x3 stride-1 pad-1 conv on a fixed HxW grid to a matrix
# --------------------------------------------------------------------------
def conv3x3_same_as_matrix(w, H, W, row_index, col_index, n_rows, n_cols):
    """w: [Cout, Cin, 3, 3].  col_index(oc, ...) must be contiguous in oc."""
    Cout, Cin = w.shape[0], w.shape[1]
    M = np.zeros((n_rows, n_cols), np.float32)
    for oy in range(H):
        for ox in range(W):
            c0 = col_index(0, oy, ox)
            for ky in range(3):
                for kx in range(3):
                    iy, ix = oy + ky - 1, ox + kx - 1
                    if 0 <= iy < H and 0 <= ix < W:
                        for ci in range(Cin):
                            M[row_index(ci, iy, ix), c0:c0 + Cout] = w[:, ci, ky, kx]
    return M


# --------------------------------------------------------------------------
# Parameters
# --------------------------------------------------------------------------
def init_raw_params(key, in_channels, num_classes):
    """Synthetic parameters with the exact PyTorch layer shapes."""
    ks = jax.random.split(key, 8)

    def init(k, shape, fan_in):
        return jax.random.normal(k, shape, jnp.float32) / np.sqrt(fan_in)

    w1 = init(ks[0], (16, in_channels, 3, 3), in_channels * 9)
    b1 = 0.1 * jax.random.normal(ks[1], (16,), jnp.float32)
    w2 = init(ks[2], (32, 16, 3, 3), 16 * 9)
    b2 = 0.1 * jax.random.normal(ks[3], (32,), jnp.float32)
    fw1 = init(ks[4], (128, 32), 32)
    fb1 = 0.1 * jax.random.normal(ks[5], (128,), jnp.float32)
    fw2 = init(ks[6], (num_classes, 128), 128)
    fb2 = 0.1 * jax.random.normal(ks[7], (num_classes,), jnp.float32)
    return (w1, b1, w2, b2, fw1, fb1, fw2, fb2)


def lower_params(raw, in_channels, num_classes):
    """Lower conv weights to dense matrices and pack everything into 2 slabs."""
    w1, b1, w2, b2, fw1, fb1, fw2, fb2 = [np.asarray(a, np.float32) for a in raw]
    in_feats = in_channels * 16

    # conv1: input rows (ci, y, x) on the 4x4 grid; output columns
    # (pos-in-pool-window wi, pool-window pb, out-channel oc) -> 4*4*16 = 256.
    def row1(ci, y, x):
        return ci * 16 + y * 4 + x

    def col1(oc, oy, ox):
        wi = (oy % 2) * 2 + (ox % 2)      # position inside the 2x2 pool window
        pb = (oy // 2) * 2 + (ox // 2)    # which pool window
        return wi * 64 + pb * 16 + oc

    W1d = conv3x3_same_as_matrix(w1, 4, 4, row1, col1, in_feats, 256)

    # conv2: input rows (pool-window, channel) on the pooled 2x2 grid; output
    # columns (out-position, out-channel) -> 4*32 = 128.
    def row2(ci, y, x):
        return (y * 2 + x) * 16 + ci

    def col2(oc, oy, ox):
        return (oy * 2 + ox) * 32 + oc

    W2d = conv3x3_same_as_matrix(w2, 2, 2, row2, col2, 64, 128)

    # Single bf16 weight slab (rows zero-padded to 128, tile-aligned columns)
    # and single f32 bias row.  fc2 is zero-padded to 128 classes with -1e30
    # bias on the padded lanes so their softmax mass is exactly 0.
    w_rows = max(128, in_feats)
    wslab = np.zeros((w_rows, W_SLAB_COLS), np.float32)
    wslab[:in_feats, 0:256] = W1d
    wslab[:64, 256:384] = W2d
    wslab[:32, 384:512] = fw1.T
    wslab[:128, 512:512 + num_classes] = fw2.T

    bslab = np.zeros((1, W_SLAB_COLS), np.float32)
    bslab[0, 0:256] = np.tile(b1, 16)        # matches (wi, pb, oc) column order
    bslab[0, 256:384] = np.tile(b2, 4)       # matches (pos, oc) column order
    bslab[0, 384:512] = fb1
    bslab[0, 512:512 + num_classes] = fb2
    bslab[0, 512 + num_classes:] = -1e30     # padded classes -> exp() == 0

    return dict(w=jnp.asarray(wslab, jnp.bfloat16),
                b=jnp.asarray(bslab, jnp.float32),
                num_classes=int(num_classes))


# --------------------------------------------------------------------------
# Wrapper: single fused pallas_call (M-tiled "parallel" batch grid)
# --------------------------------------------------------------------------
def _build_call(B_pad, TM, in_feats, w, b, num_tiles, use_pipeline_mode):
    if use_pipeline_mode:
        # Grid-invariant weight/bias blocks never need double buffering; nor
        # does anything when there is only one grid step.
        const_kw = dict(pipeline_mode=pl.Buffered(1))
        io_kw = dict(pipeline_mode=pl.Buffered(1)) if num_tiles == 1 else {}
    else:
        const_kw, io_kw = {}, {}

    in_specs = [
        pl.BlockSpec((TM, in_feats), lambda i: (i, 0), **io_kw),
        pl.BlockSpec(w.shape, lambda i: (0, 0), **const_kw),
        pl.BlockSpec(b.shape, lambda i: (0, 0), **const_kw),
    ]
    out_spec = pl.BlockSpec((TM, LOGIT_LANES), lambda i: (i, 0), **io_kw)

    flops = 2 * B_pad * (in_feats * 256 + 64 * 128 + 32 * 128 + 128 * LOGIT_LANES)
    bytes_accessed = (B_pad * in_feats * 2 + int(w.size) * 2 + int(b.size) * 4
                      + B_pad * LOGIT_LANES * 4)

    return pl.pallas_call(
        cnn_kernel,
        out_shape=jax.ShapeDtypeStruct((B_pad, LOGIT_LANES), jnp.float32),
        grid=(num_tiles,),
        in_specs=in_specs,
        out_specs=out_spec,
        compiler_params=pltpu.CompilerParams(
            dimension_semantics=("parallel",)),
        cost_estimate=pl.CostEstimate(
            flops=flops, transcendentals=B_pad * LOGIT_LANES,
            bytes_accessed=bytes_accessed),
    )


def simple_cnn_softmax_forward(x, p, *, tm=256):
    B = x.shape[0]
    # Ship x as bf16 (it is consumed in bf16 by the MXU anyway): halves the
    # only batch-proportional HBM read.
    x2 = x.reshape(B, -1).astype(jnp.bfloat16)       # (B, Cin*16), (ci, y, x)
    in_feats = x2.shape[1]
    nc = p["num_classes"]
    w, b = p["w"], p["b"]

    TM = B if B <= tm else tm
    num_tiles = pl.cdiv(B, TM)
    B_pad = num_tiles * TM
    if B_pad != B:
        x2 = jnp.pad(x2, ((0, B_pad - B), (0, 0)))

    try:
        out = _build_call(B_pad, TM, in_feats, w, b, num_tiles, True)(x2, w, b)
    except Exception:
        # Conservative fallback if this JAX build rejects BlockSpec
        # pipeline_mode / pl.Buffered.
        out = _build_call(B_pad, TM, in_feats, w, b, num_tiles, False)(x2, w, b)

    return out[:B, :nc]


# --------------------------------------------------------------------------
# Pure-JAX reference (same math, standard conv/pool ops) for validation
# --------------------------------------------------------------------------
def _maxpool2x2(t):  # t: [B, C, H, W]
    return jnp.maximum(
        jnp.maximum(t[:, :, 0::2, 0::2], t[:, :, 0::2, 1::2]),
        jnp.maximum(t[:, :, 1::2, 0::2], t[:, :, 1::2, 1::2]))


def reference_forward(x, raw):
    w1, b1, w2, b2, fw1, fb1, fw2, fb2 = raw
    dn = ("NCHW", "OIHW", "NCHW")
    h = jax.lax.conv_general_dilated(x, w1, (1, 1), ((1, 1), (1, 1)),
                                     dimension_numbers=dn)
    h = _maxpool2x2(jnp.maximum(h + b1[None, :, None, None], 0.0))
    h = jax.lax.conv_general_dilated(h, w2, (1, 1), ((1, 1), (1, 1)),
                                     dimension_numbers=dn)
    h = _maxpool2x2(jnp.maximum(h + b2[None, :, None, None], 0.0))
    h = h.reshape(h.shape[0], -1)                    # (B, 32)
    h = jnp.maximum(h @ fw1.T + fb1, 0.0)
    logits = h @ fw2.T + fb2
    return jax.nn.softmax(logits, axis=-1)


if __name__ == "__main__":
    # Spatial size 4x4 is implied by fc1 = nn.Linear(32 * 1 * 1, 128).
    B, IN_CHANNELS, H, W = 2, 4, 4, 4

    key = jax.random.PRNGKey(0)
    kx, kp = jax.random.split(key)
    x = jax.random.normal(kx, (B, IN_CHANNELS, H, W), jnp.float32)

    raw = init_raw_params(kp, IN_CHANNELS, NUM_CLASSES)
    params = lower_params(raw, IN_CHANNELS, NUM_CLASSES)

    out = simple_cnn_softmax_forward(x, params)
    out = jax.block_until_ready(out)

    assert out.shape == (B, NUM_CLASSES)
    assert bool(jnp.all(jnp.isfinite(out)))
    # rows are probabilities
    assert bool(jnp.allclose(jnp.sum(out, axis=-1), 1.0, atol=1e-3))
    # parity with a plain-JAX reference (loose tol: matmul operands are bf16)
    ref = reference_forward(x, raw)
    assert bool(jnp.allclose(out, ref, atol=5e-2)), (out, ref)

    print("KERNEL_OK")
</pallas_src>

<mosaic_0001>
module attributes {stable_mosaic.version = 11 : i64} {
  func.func @cnn_kernel(%arg0: i32, %arg1: memref<2x64xbf16, #tpu.memory_space<vmem>>, %arg2: memref<128x640xbf16, #tpu.memory_space<vmem>>, %arg3: memref<1x640xf32, #tpu.memory_space<vmem>>, %arg4: memref<2x128xf32, #tpu.memory_space<vmem>>) attributes {dimension_semantics = [#tpu.dimension_semantics<parallel>], iteration_bounds = array<i64: 1>, scalar_prefetch = 0 : i64, scratch_operands = 0 : i64, tpu.core_type = #tpu.core_type<tc>, window_params = [{pipeline_mode = #tpu.pipeline_mode<synchronous>, transform_indices = @transform_0, window_bounds = array<i64: 2, 64>}, {pipeline_mode = #tpu.pipeline_mode<synchronous>, transform_indices = @transform_1, window_bounds = array<i64: 128, 640>}, {pipeline_mode = #tpu.pipeline_mode<synchronous>, transform_indices = @transform_2, window_bounds = array<i64: 1, 640>}, {pipeline_mode = #tpu.pipeline_mode<synchronous>, transform_indices = @transform_3, window_bounds = array<i64: 2, 128>}]} {
    %c0 = arith.constant 0 : index
    %c0_0 = arith.constant 0 : index
    %0 = vector.load %arg1[%c0, %c0_0] : memref<2x64xbf16, #tpu.memory_space<vmem>>, vector<2x64xbf16>
    %c0_1 = arith.constant 0 : index
    %c0_2 = arith.constant 0 : index
    %1 = vector.load %arg2[%c0_1, %c0_2] : memref<128x640xbf16, #tpu.memory_space<vmem>>, vector<64x256xbf16>
    %cst = arith.constant dense<0.000000e+00> : vector<2x256xf32>
    %2 = tpu.matmul %0, %1, %cst {dimension_numbers = #tpu.dot_dimension_numbers<[1], [0], [0], [1], [0, 0, 1, 1], [], []>} : vector<2x64xbf16>, vector<64x256xbf16>, vector<2x256xf32> -> vector<2x256xf32>
    %c0_3 = arith.constant 0 : index
    %c0_4 = arith.constant 0 : index
    %3 = vector.load %arg3[%c0_3, %c0_4] : memref<1x640xf32, #tpu.memory_space<vmem>>, vector<1x256xf32>
    %4 = vector.broadcast %3 : vector<1x256xf32> to vector<2x256xf32>
    %5 = arith.addf %2, %4 : vector<2x256xf32>
    %cst_5 = arith.constant 0.000000e+00 : f32
    %6 = vector.broadcast %cst_5 : f32 to vector<2x256xf32>
    %7 = arith.maximumf %5, %6 : vector<2x256xf32>
    %8 = vector.extract_strided_slice %7 {offsets = [0, 0], sizes = [2, 64], strides = [1, 1]} : vector<2x256xf32> to vector<2x64xf32>
    %9 = vector.extract_strided_slice %7 {offsets = [0, 64], sizes = [2, 64], strides = [1, 1]} : vector<2x256xf32> to vector<2x64xf32>
    %10 = arith.maximumf %8, %9 : vector<2x64xf32>
    %11 = vector.extract_strided_slice %7 {offsets = [0, 128], sizes = [2, 64], strides = [1, 1]} : vector<2x256xf32> to vector<2x64xf32>
    %12 = vector.extract_strided_slice %7 {offsets = [0, 192], sizes = [2, 64], strides = [1, 1]} : vector<2x256xf32> to vector<2x64xf32>
    %13 = arith.maximumf %11, %12 : vector<2x64xf32>
    %14 = arith.maximumf %10, %13 : vector<2x64xf32>
    %15 = arith.truncf %14 : vector<2x64xf32> to vector<2x64xbf16>
    %c0_6 = arith.constant 0 : index
    %c256 = arith.constant 256 : index
    %16 = vector.load %arg2[%c0_6, %c256] : memref<128x640xbf16, #tpu.memory_space<vmem>>, vector<64x128xbf16>
    %cst_7 = arith.constant dense<0.000000e+00> : vector<2x128xf32>
    %17 = tpu.matmul %15, %16, %cst_7 {dimension_numbers = #tpu.dot_dimension_numbers<[1], [0], [0], [1], [0, 0, 1, 1], [], []>} : vector<2x64xbf16>, vector<64x128xbf16>, vector<2x128xf32> -> vector<2x128xf32>
    %c0_8 = arith.constant 0 : index
    %c256_9 = arith.constant 256 : index
    %18 = vector.load %arg3[%c0_8, %c256_9] : memref<1x640xf32, #tpu.memory_space<vmem>>, vector<1x128xf32>
    %19 = vector.broadcast %18 : vector<1x128xf32> to vector<2x128xf32>
    %20 = arith.addf %17, %19 : vector<2x128xf32>
    %cst_10 = arith.constant 0.000000e+00 : f32
    %21 = vector.broadcast %cst_10 : f32 to vector<2x128xf32>
    %22 = arith.maximumf %20, %21 : vector<2x128xf32>
    %23 = vector.extract_strided_slice %22 {offsets = [0, 0], sizes = [2, 32], strides = [1, 1]} : vector<2x128xf32> to vector<2x32xf32>
    %24 = vector.extract_strided_slice %22 {offsets = [0, 32], sizes = [2, 32], strides = [1, 1]} : vector<2x128xf32> to vector<2x32xf32>
    %25 = arith.maximumf %23, %24 : vector<2x32xf32>
    %26 = vector.extract_strided_slice %22 {offsets = [0, 64], sizes = [2, 32], strides = [1, 1]} : vector<2x128xf32> to vector<2x32xf32>
    %27 = vector.extract_strided_slice %22 {offsets = [0, 96], sizes = [2, 32], strides = [1, 1]} : vector<2x128xf32> to vector<2x32xf32>
    %28 = arith.maximumf %26, %27 : vector<2x32xf32>
    %29 = arith.maximumf %25, %28 : vector<2x32xf32>
    %30 = arith.truncf %29 : vector<2x32xf32> to vector<2x32xbf16>
    %c0_11 = arith.constant 0 : index
    %c384 = arith.constant 384 : index
    %31 = vector.load %arg2[%c0_11, %c384] : memref<128x640xbf16, #tpu.memory_space<vmem>>, vector<32x128xbf16>
    %cst_12 = arith.constant dense<0.000000e+00> : vector<2x128xf32>
    %32 = tpu.matmul %30, %31, %cst_12 {dimension_numbers = #tpu.dot_dimension_numbers<[1], [0], [0], [1], [0, 0, 1, 1], [], []>} : vector<2x32xbf16>, vector<32x128xbf16>, vector<2x128xf32> -> vector<2x128xf32>
    %c0_13 = arith.constant 0 : index
    %c384_14 = arith.constant 384 : index
    %33 = vector.load %arg3[%c0_13, %c384_14] : memref<1x640xf32, #tpu.memory_space<vmem>>, vector<1x128xf32>
    %34 = vector.broadcast %33 : vector<1x128xf32> to vector<2x128xf32>
    %35 = arith.addf %32, %34 : vector<2x128xf32>
    %cst_15 = arith.constant 0.000000e+00 : f32
    %36 = vector.broadcast %cst_15 : f32 to vector<2x128xf32>
    %37 = arith.maximumf %35, %36 : vector<2x128xf32>
    %38 = arith.truncf %37 : vector<2x128xf32> to vector<2x128xbf16>
    %c0_16 = arith.constant 0 : index
    %c512 = arith.constant 512 : index
    %39 = vector.load %arg2[%c0_16, %c512] : memref<128x640xbf16, #tpu.memory_space<vmem>>, vector<128x128xbf16>
    %cst_17 = arith.constant dense<0.000000e+00> : vector<2x128xf32>
    %40 = tpu.matmul %38, %39, %cst_17 {dimension_numbers = #tpu.dot_dimension_numbers<[1], [0], [0], [1], [0, 0, 1, 1], [], []>} : vector<2x128xbf16>, vector<128x128xbf16>, vector<2x128xf32> -> vector<2x128xf32>
    %c0_18 = arith.constant 0 : index
    %c512_19 = arith.constant 512 : index
    %41 = vector.load %arg3[%c0_18, %c512_19] : memref<1x640xf32, #tpu.memory_space<vmem>>, vector<1x128xf32>
    %42 = vector.broadcast %41 : vector<1x128xf32> to vector<2x128xf32>
    %43 = arith.addf %40, %42 : vector<2x128xf32>
    %cst_20 = arith.constant dense<0xFF800000> : vector<2xf32>
    %44 = vector.multi_reduction <maximumf>, %43, %cst_20 [1] : vector<2x128xf32> to vector<2xf32>
    %45 = vector.shape_cast %44 : vector<2xf32> to vector<2x1xf32>
    %46 = vector.broadcast %45 : vector<2x1xf32> to vector<2x128xf32>
    %47 = arith.subf %43, %46 : vector<2x128xf32>
    %48 = math.exp %47 : vector<2x128xf32>
    %cst_21 = arith.constant dense<0.000000e+00> : vector<2xf32>
    %49 = vector.multi_reduction <add>, %48, %cst_21 [1] : vector<2x128xf32> to vector<2xf32>
    %50 = vector.shape_cast %49 : vector<2xf32> to vector<2x1xf32>
    %51 = vector.broadcast %50 : vector<2x1xf32> to vector<2x128xf32>
    %52 = arith.divf %48, %51 : vector<2x128xf32>
    %c0_22 = arith.constant 0 : index
    %c0_23 = arith.constant 0 : index
    %53 = vector.load %arg4[%c0_22, %c0_23] : memref<2x128xf32, #tpu.memory_space<vmem>>, vector<2x128xf32>
    tpu.vector_store %arg4[%c0_22, %c0_23], %52 {strides = array<i32>} : memref<2x128xf32, #tpu.memory_space<vmem>>, vector<2x128xf32>,
    return
  }
  func.func @transform_0(%arg0: i32) -> (i32, i32) {
    %c0_i32 = arith.constant 0 : i32
    %c0_i32_0 = arith.constant 0 : i32
    return %arg0, %c0_i32 : i32, i32
  }
  func.func @transform_1(%arg0: i32) -> (i32, i32) {
    %c0_i32 = arith.constant 0 : i32
    %c0_i32_0 = arith.constant 0 : i32
    %c0_i32_1 = arith.constant 0 : i32
    return %c0_i32, %c0_i32_0 : i32, i32
  }
  func.func @transform_2(%arg0: i32) -> (i32, i32) {
    %c0_i32 = arith.constant 0 : i32
    %c0_i32_0 = arith.constant 0 : i32
    %c0_i32_1 = arith.constant 0 : i32
    return %c0_i32, %c0_i32_0 : i32, i32
  }
  func.func @transform_3(%arg0: i32) -> (i32, i32) {
    %c0_i32 = arith.constant 0 : i32
    %c0_i32_0 = arith.constant 0 : i32
    return %arg0, %c0_i32 : i32, i32
  }
}

module attributes {stable_mosaic.version = 11 : i64} {
  func.func @cnn_kernel(%arg0: i32, %arg1: memref<2x64xbf16, #tpu.memory_space<vmem>>, %arg2: memref<128x640xbf16, #tpu.memory_space<vmem>>, %arg3: memref<1x640xf32, #tpu.memory_space<vmem>>, %arg4: memref<2x128xf32, #tpu.memory_space<vmem>>) attributes {dimension_semantics = [#tpu.dimension_semantics<parallel>], iteration_bounds = array<i64: 1>, scalar_prefetch = 0 : i64, scratch_operands = 0 : i64, tpu.core_type = #tpu.core_type<tc>, window_params = [{transform_indices = @transform_0, window_bounds = array<i64: 2, 64>}, {pipeline_mode = #tpu.pipeline_mode<synchronous>, transform_indices = @transform_1, window_bounds = array<i64: 128, 640>}, {pipeline_mode = #tpu.pipeline_mode<synchronous>, transform_indices = @transform_2, window_bounds = array<i64: 1, 640>}, {transform_indices = @transform_3, window_bounds = array<i64: 2, 128>}]} {
    %c0 = arith.constant 0 : index
    %c0_0 = arith.constant 0 : index
    %0 = vector.load %arg1[%c0, %c0_0] : memref<2x64xbf16, #tpu.memory_space<vmem>>, vector<2x64xbf16>
    %c0_1 = arith.constant 0 : index
    %c0_2 = arith.constant 0 : index
    %1 = vector.load %arg2[%c0_1, %c0_2] : memref<128x640xbf16, #tpu.memory_space<vmem>>, vector<64x256xbf16>
    %cst = arith.constant dense<0.000000e+00> : vector<2x256xf32>
    %2 = tpu.matmul %0, %1, %cst {dimension_numbers = #tpu.dot_dimension_numbers<[1], [0], [0], [1], [0, 0, 1, 1], [], []>} : vector<2x64xbf16>, vector<64x256xbf16>, vector<2x256xf32> -> vector<2x256xf32>
    %c0_3 = arith.constant 0 : index
    %c0_4 = arith.constant 0 : index
    %3 = vector.load %arg3[%c0_3, %c0_4] : memref<1x640xf32, #tpu.memory_space<vmem>>, vector<1x256xf32>
    %4 = vector.broadcast %3 : vector<1x256xf32> to vector<2x256xf32>
    %5 = arith.addf %2, %4 : vector<2x256xf32>
    %cst_5 = arith.constant 0.000000e+00 : f32
    %6 = vector.broadcast %cst_5 : f32 to vector<2x256xf32>
    %7 = arith.maximumf %5, %6 : vector<2x256xf32>
    %8 = vector.extract_strided_slice %7 {offsets = [0, 0], sizes = [2, 64], strides = [1, 1]} : vector<2x256xf32> to vector<2x64xf32>
    %9 = vector.extract_strided_slice %7 {offsets = [0, 64], sizes = [2, 64], strides = [1, 1]} : vector<2x256xf32> to vector<2x64xf32>
    %10 = arith.maximumf %8, %9 : vector<2x64xf32>
    %11 = vector.extract_strided_slice %7 {offsets = [0, 128], sizes = [2, 64], strides = [1, 1]} : vector<2x256xf32> to vector<2x64xf32>
    %12 = vector.extract_strided_slice %7 {offsets = [0, 192], sizes = [2, 64], strides = [1, 1]} : vector<2x256xf32> to vector<2x64xf32>
    %13 = arith.maximumf %11, %12 : vector<2x64xf32>
    %14 = arith.maximumf %10, %13 : vector<2x64xf32>
    %15 = arith.truncf %14 : vector<2x64xf32> to vector<2x64xbf16>
    %c0_6 = arith.constant 0 : index
    %c256 = arith.constant 256 : index
    %16 = vector.load %arg2[%c0_6, %c256] : memref<128x640xbf16, #tpu.memory_space<vmem>>, vector<64x128xbf16>
    %cst_7 = arith.constant dense<0.000000e+00> : vector<2x128xf32>
    %17 = tpu.matmul %15, %16, %cst_7 {dimension_numbers = #tpu.dot_dimension_numbers<[1], [0], [0], [1], [0, 0, 1, 1], [], []>} : vector<2x64xbf16>, vector<64x128xbf16>, vector<2x128xf32> -> vector<2x128xf32>
    %c0_8 = arith.constant 0 : index
    %c256_9 = arith.constant 256 : index
    %18 = vector.load %arg3[%c0_8, %c256_9] : memref<1x640xf32, #tpu.memory_space<vmem>>, vector<1x128xf32>
    %19 = vector.broadcast %18 : vector<1x128xf32> to vector<2x128xf32>
    %20 = arith.addf %17, %19 : vector<2x128xf32>
    %cst_10 = arith.constant 0.000000e+00 : f32
    %21 = vector.broadcast %cst_10 : f32 to vector<2x128xf32>
    %22 = arith.maximumf %20, %21 : vector<2x128xf32>
    %23 = vector.extract_strided_slice %22 {offsets = [0, 0], sizes = [2, 32], strides = [1, 1]} : vector<2x128xf32> to vector<2x32xf32>
    %24 = vector.extract_strided_slice %22 {offsets = [0, 32], sizes = [2, 32], strides = [1, 1]} : vector<2x128xf32> to vector<2x32xf32>
    %25 = arith.maximumf %23, %24 : vector<2x32xf32>
    %26 = vector.extract_strided_slice %22 {offsets = [0, 64], sizes = [2, 32], strides = [1, 1]} : vector<2x128xf32> to vector<2x32xf32>
    %27 = vector.extract_strided_slice %22 {offsets = [0, 96], sizes = [2, 32], strides = [1, 1]} : vector<2x128xf32> to vector<2x32xf32>
    %28 = arith.maximumf %26, %27 : vector<2x32xf32>
    %29 = arith.maximumf %25, %28 : vector<2x32xf32>
    %30 = arith.truncf %29 : vector<2x32xf32> to vector<2x32xbf16>
    %c0_11 = arith.constant 0 : index
    %c384 = arith.constant 384 : index
    %31 = vector.load %arg2[%c0_11, %c384] : memref<128x640xbf16, #tpu.memory_space<vmem>>, vector<32x128xbf16>
    %cst_12 = arith.constant dense<0.000000e+00> : vector<2x128xf32>
    %32 = tpu.matmul %30, %31, %cst_12 {dimension_numbers = #tpu.dot_dimension_numbers<[1], [0], [0], [1], [0, 0, 1, 1], [], []>} : vector<2x32xbf16>, vector<32x128xbf16>, vector<2x128xf32> -> vector<2x128xf32>
    %c0_13 = arith.constant 0 : index
    %c384_14 = arith.constant 384 : index
    %33 = vector.load %arg3[%c0_13, %c384_14] : memref<1x640xf32, #tpu.memory_space<vmem>>, vector<1x128xf32>
    %34 = vector.broadcast %33 : vector<1x128xf32> to vector<2x128xf32>
    %35 = arith.addf %32, %34 : vector<2x128xf32>
    %cst_15 = arith.constant 0.000000e+00 : f32
    %36 = vector.broadcast %cst_15 : f32 to vector<2x128xf32>
    %37 = arith.maximumf %35, %36 : vector<2x128xf32>
    %38 = arith.truncf %37 : vector<2x128xf32> to vector<2x128xbf16>
    %c0_16 = arith.constant 0 : index
    %c512 = arith.constant 512 : index
    %39 = vector.load %arg2[%c0_16, %c512] : memref<128x640xbf16, #tpu.memory_space<vmem>>, vector<128x128xbf16>
    %cst_17 = arith.constant dense<0.000000e+00> : vector<2x128xf32>
    %40 = tpu.matmul %38, %39, %cst_17 {dimension_numbers = #tpu.dot_dimension_numbers<[1], [0], [0], [1], [0, 0, 1, 1], [], []>} : vector<2x128xbf16>, vector<128x128xbf16>, vector<2x128xf32> -> vector<2x128xf32>
    %c0_18 = arith.constant 0 : index
    %c512_19 = arith.constant 512 : index
    %41 = vector.load %arg3[%c0_18, %c512_19] : memref<1x640xf32, #tpu.memory_space<vmem>>, vector<1x128xf32>
    %42 = vector.broadcast %41 : vector<1x128xf32> to vector<2x128xf32>
    %43 = arith.addf %40, %42 : vector<2x128xf32>
    %cst_20 = arith.constant dense<0xFF800000> : vector<2xf32>
    %44 = vector.multi_reduction <maximumf>, %43, %cst_20 [1] : vector<2x128xf32> to vector<2xf32>
    %45 = vector.shape_cast %44 : vector<2xf32> to vector<2x1xf32>
    %46 = vector.broadcast %45 : vector<2x1xf32> to vector<2x128xf32>
    %47 = arith.subf %43, %46 : vector<2x128xf32>
    %48 = math.exp %47 : vector<2x128xf32>
    %cst_21 = arith.constant dense<0.000000e+00> : vector<2xf32>
    %49 = vector.multi_reduction <add>, %48, %cst_21 [1] : vector<2x128xf32> to vector<2xf32>
    %50 = vector.shape_cast %49 : vector<2xf32> to vector<2x1xf32>
    %51 = vector.broadcast %50 : vector<2x1xf32> to vector<2x128xf32>
    %52 = arith.divf %48, %51 : vector<2x128xf32>
    %c0_22 = arith.constant 0 : index
    %c0_23 = arith.constant 0 : index
    %53 = vector.load %arg4[%c0_22, %c0_23] : memref<2x128xf32, #tpu.memory_space<vmem>>, vector<2x128xf32>
    tpu.vector_store %arg4[%c0_22, %c0_23], %52 {strides = array<i32>} : memref<2x128xf32, #tpu.memory_space<vmem>>, vector<2x128xf32>,
    return
  }
  func.func @transform_0(%arg0: i32) -> (i32, i32) {
    %c0_i32 = arith.constant 0 : i32
    %c0_i32_0 = arith.constant 0 : i32
    return %arg0, %c0_i32 : i32, i32
  }
  func.func @transform_1(%arg0: i32) -> (i32, i32) {
    %c0_i32 = arith.constant 0 : i32
    %c0_i32_0 = arith.constant 0 : i32
    %c0_i32_1 = arith.constant 0 : i32
    return %c0_i32, %c0_i32_0 : i32, i32
  }
  func.func @transform_2(%arg0: i32) -> (i32, i32) {
    %c0_i32 = arith.constant 0 : i32
    %c0_i32_0 = arith.constant 0 : i32
    %c0_i32_1 = arith.constant 0 : i32
    return %c0_i32, %c0_i32_0 : i32, i32
  }
  func.func @transform_3(%arg0: i32) -> (i32, i32) {
    %c0_i32 = arith.constant 0 : i32
    %c0_i32_0 = arith.constant 0 : i32
    return %arg0, %c0_i32 : i32, i32
  }
}

</mosaic_0001>

<bundles_post_ra>
// kernel: tpu_custom_call.1
= control target key start
LH: loop header
LB: loop body
LE: loop exit
PB: predicated region body
PF: predicated region fallthrough
CT: control target
= control target key end

     0   :  { %8 = vsyncpa [#allocation3], 0  ;;  %s667_s0 = inlined_call_operand.hbm [shape: bf16[2,64], index: 0, kind: input, shape index: {}]   ;;  %s668_s1 = inlined_call_operand.hbm [shape: bf16[128,640], index: 1, kind: input, shape index: {}]   ;;  %s669_s2 = inlined_call_operand.hbm [shape: f32[1,640], index: 2, kind: input, shape index: {}]   ;;  %s670_s3 = inlined_call_operand.hbm [shape: f32[2,128], index: 3, kind: output, shape index: {}]  }
   0x1   :  { %9 = vsyncpa [#allocation6], 0  ;;  %s26_s14 = sshll.u32 %s668_s1, 4  ;;  %s27_s14 = int_to_ptr.hbm [resolvable:$true] %s26_s14 }
   0x2   :  { %10 = vsyncpa [#allocation4], 0  ;;  %s622_s15 = smov [#allocation5]   ;;  %s16_s19 = sshll.u32 %s667_s0, 4  ;;  %s17_s19 = int_to_ptr.hbm [resolvable:$true] %s16_s19 }
   0x3   :  { %s28_s16 = sshll.u32 %s622_s15, 4  ;;  %s623_s20 = smov 320   ;;  %s29_s16 = int_to_ptr.vmem [resolvable:$true] %s28_s16 }
   0x4   :  { %s624_s21 = smov 20   ;;  %s625_s22 = smov [#allocation2]  }
   0x5   :  { %34 = dma.hbm_to_vmem [thread:$0]  %s27_s14, 5120, %s29_s16, [#allocation6], %s623_s20, %s623_s20, %s624_s21  }
   0x6   :  { %s18_s23 = sshll.u32 %s625_s22, 4  ;;  %s40_s26 = sshll.u32 %s669_s2, 4  ;;  %s19_s23 = int_to_ptr.vmem [resolvable:$true] %s18_s23  ;;  %s41_s26 = int_to_ptr.hbm [resolvable:$true] %s40_s26 }
   0x7   :  { %21 = dma.hbm_to_vmem [thread:$0]  %s17_s19, 16, %s19_s23, [#allocation3]  }
   0x8   :  { %s626_s1 = smov [#allocation7]  }
   0x9   :  { %s42_s27 = sshll.u32 %s626_s1, 4  ;;  %s43_s27 = int_to_ptr.vmem [resolvable:$true] %s42_s27 }
   0xa   :  { %45 = dma.hbm_to_vmem [thread:$0]  %s41_s26, 80, %s43_s27, [#allocation6]  }
   0xb   :  { %616 = dma.done.wait [#allocation3], 16  }
   0xc   :  { %617 = vsyncadd [#allocation3], 4294967280 }
   0xd   :  { %618 = dma.done.wait [#allocation6], 5200  }
   0xe   :  { %619 = vsyncadd [#allocation6], 4294962096  ;;  %v412_v0 = vld [vmem:[#allocation5 + $0x78] sm:$0xf]  ;;  %v485_v1 = vld [vmem:[#allocation5 + $0x88] sm:$0xf0] }
   0xf   :  { %v484_v2 = vld [vmem:[#allocation5 + $0x7c] sm:$0xf]  ;;  %v413_v3 = vor.u32 %v485_v1, %v412_v0  ;;  %v414_v4 = vld [vmem:[#allocation5 + $0x8c] sm:$0xf0]  ;;  %v483_v6 = vld [vmem:[#allocation5 + $0x60] sm:$0xf0] }
  0x10   :  { %v404_v5 = vld [vmem:[#allocation5 + $0x50] sm:$0xf]  ;;  %v417_v7 = vor.u32 %v484_v2, %v414_v4  ;;  %v482_v8 = vld [vmem:[#allocation5 + $0x54] sm:$0xf]  ;;  %v406_v9 = vld [vmem:[#allocation5 + $0x64] sm:$0xf0] }
  0x11   :  { %122 = vmatpush.bf16.msra.mxu0 %v413_v3  ;;  %v405_v10 = vor.u32 %v483_v6, %v404_v5  ;;  %v409_v11 = vor.u32 %v482_v8, %v406_v9  ;;  %v396_v12 = vld [vmem:[#allocation5 + $0x28] sm:$0xf]  ;;  %v481_v13 = vld [vmem:[#allocation5 + $0x38] sm:$0xf0]  ;;  %v480_v14 = vld [vmem:[#allocation5 + $0x2c] sm:$0xf] }
  0x12   :  { %135 = vmatpush.bf16.msra.mxu1 %v417_v7  ;;  %v398_v15 = vld [vmem:[#allocation5 + $0x3c] sm:$0xf0]  ;;  %v397_v16 = vor.u32 %v481_v13, %v396_v12  ;;  %v479_v19 = vld [vmem:[#allocation5 + $0x10] sm:$0xf0]  ;;  %v478_v20 = vld [vmem:[#allocation5 + $0x4] sm:$0xf] }
  0x13   :  { %v401_v17 = vor.u32 %v480_v14, %v398_v15  ;;  %v388_v18 = vld [vmem:[#allocation5] sm:$0xf]  ;;  %v390_v21 = vld [vmem:[#allocation5 + $0x14] sm:$0xf0]  ;;  %v59_v24 = vld [vmem:[#allocation2] sm:$0x1] }
  0x14   :  { %v389_v22 = vor.u32 %v479_v19, %v388_v18  ;;  %v393_v23 = vor.u32 %v478_v20, %v390_v21  ;;  %vm114_vm0 = vcmask 523264   ;;  %v434_v25 = vld [vmem:[#allocation5 + $0x80] sm:$0xf]  ;;  %v489_v26 = vld [vmem:[#allocation5 + $0x90] sm:$0xf0]  ;;  %s627_s0 = smov 64  }
  0x15   :  { %123 = vmatpush.bf16.msra.mxu0 %v405_v10  ;;  %v430_v27 = vld [vmem:[#allocation5 + $0x58] sm:$0xf]  ;;  %v435_v28 = vor.u32 %v489_v26, %v434_v25  ;;  %v488_v29 = vld [vmem:[#allocation5 + $0x68] sm:$0xf0]  ;;  %v68_v31 = vld [vmem:[#allocation7] sm:$0x3] }
  0x16   :  { %136 = vmatpush.bf16.msra.mxu1 %v409_v11  ;;  %v431_v30 = vor.u32 %v488_v29, %v430_v27  ;;  %v70_v32 = vperm.slane %v68_v31, 0  ;;  %v71_v33 = vperm.slane %v68_v31, 1  ;;  %v426_v43 = vld [vmem:[#allocation5 + $0x30] sm:$0xf]  ;;  %v487_v44 = vld [vmem:[#allocation5 + $0x40] sm:$0xf0] }
  0x17   :  { %201 = vmatpush.bf16.msra.mxu2 %v435_v28  ;;  %v427_v45 = vor.u32 %v487_v44, %v426_v43  ;;  %v422_v46 = vld [vmem:[#allocation5 + $0x8] sm:$0xf]  ;;  %v486_v47 = vld [vmem:[#allocation5 + $0x18] sm:$0xf0]  ;;  %v513_v56 = vld [vmem:[#allocation7 + $0x2] ss:$0 sm:$0xff] }
  0x18   :  { %v423_v48 = vor.u32 %v486_v47, %v422_v46  ;;  %s628_s2 = smov 96   ;;  %v443_v61 = vld [vmem:[#allocation5 + $0x34] sm:$0xf]  ;;  %v491_v62 = vld [vmem:[#allocation5 + $0x44] sm:$0xf0]  ;;  %vm242_vm1 = vcmask 261120  }
  0x19   :  { %124 = vmatpush.bf16.msra.mxu0 %v397_v16  ;;  %v439_v63 = vld [vmem:[#allocation5 + $0xc] sm:$0xf]  ;;  %v444_v0 = vor.u32 %v491_v62, %v443_v61  ;;  %v490_v1 = vld [vmem:[#allocation5 + $0x1c] sm:$0xf0]  ;;  %v476_v5 = vld [vmem:[#allocation5 + $0x128] sm:$0xf] }
  0x1a   :  { %137 = vmatpush.bf16.msra.mxu1 %v401_v17  ;;  %v440_v2 = vor.u32 %v490_v1, %v439_v63  ;;  %v499_v6 = vld [vmem:[#allocation5 + $0x138] sm:$0xf0]  ;;  %v472_v7 = vld [vmem:[#allocation5 + $0x100] sm:$0xf]  ;;  %v498_v9 = vld [vmem:[#allocation5 + $0x110] sm:$0xf0] }
  0x1b   :  { %202 = vmatpush.bf16.msra.mxu2 %v431_v30  ;;  %v477_v8 = vor.u32 %v499_v6, %v476_v5  ;;  %v473_v10 = vor.u32 %v498_v9, %v472_v7  ;;  %v468_v11 = vld [vmem:[#allocation5 + $0xd8] sm:$0xf]  ;;  %v497_v12 = vld [vmem:[#allocation5 + $0xe8] sm:$0xf0]  ;;  %v464_v14 = vld [vmem:[#allocation5 + $0xb0] sm:$0xf] }
  0x1c   :  { %v469_v13 = vor.u32 %v497_v12, %v468_v11  ;;  %v496_v15 = vld [vmem:[#allocation5 + $0xc0] sm:$0xf0]  ;;  %v460_v17 = vld [vmem:[#allocation5 + $0x88] sm:$0xf]  ;;  %v495_v18 = vld [vmem:[#allocation5 + $0x98] sm:$0xf0] }
  0x1d   :  { %125 = vmatpush.bf16.msra.mxu0 %v389_v22  ;;  %329 = vmatpush.bf16.msra.mxu3 %v477_v8  ;;  %v465_v16 = vor.u32 %v496_v15, %v464_v14  ;;  %v461_v19 = vor.u32 %v495_v18, %v460_v17  ;;  %v456_v20 = vld [vmem:[#allocation5 + $0x60] sm:$0xf]  ;;  %v494_v21 = vld [vmem:[#allocation5 + $0x70] sm:$0xf0]  ;;  %v452_v26 = vld [vmem:[#allocation5 + $0x38] sm:$0xf] }
  0x1e   :  { %138 = vmatpush.bf16.msra.mxu1 %v393_v23  ;;  %v457_v22 = vor.u32 %v494_v21, %v456_v20  ;;  %v493_v27 = vld [vmem:[#allocation5 + $0x48] sm:$0xf0]  ;;  %v448_v29 = vld [vmem:[#allocation5 + $0x10] sm:$0xf]  ;;  %v492_v30 = vld [vmem:[#allocation5 + $0x20] sm:$0xf0] }
  0x1f   :  { %203 = vmatpush.bf16.msra.mxu2 %v427_v45  ;;  %v453_v28 = vor.u32 %v493_v27, %v452_v26  ;;  %v449_v31 = vor.u32 %v492_v30, %v448_v29  ;;  %vm342_vm2 = vcmask 1041408   ;;  %s629_s28 = smov [#allocation8]   ;;  %s375_s5 = sshll.u32 %s670_s3, 4  ;;  %s376_s5 = int_to_ptr.hbm [resolvable:$true] %s375_s5 }
  0x20   :  { %418 = vmatmul.msk.bf16.vlgmr.msra.gmra.mxu0 %vm114_vm0, %v59_v24  ;;  %s373_s29 = sshll.u32 %s629_s28, 4  ;;  %s374_s29 = int_to_ptr.vmem [resolvable:$true] %s373_s29 }
  0x21   :  { %419 = vmatmul.msk.bf16.vlgmr.msra.gmra.mxu1 %vm114_vm0, %v59_v24  ;;  %252 = vmatpush.bf16.msrb.mxu0 %v444_v0 }
  0x22   :  { %330 = vmatpush.bf16.msra.mxu3 %v473_v10 }
  0x23   :  { %204 = vmatpush.bf16.msra.mxu2 %v423_v48 }
  0x25   :  { %253 = vmatpush.bf16.msrb.mxu0 %v440_v2 }
  0x26   :  { %331 = vmatpush.bf16.msra.mxu3 %v469_v13 }
  0x2a   :  { %332 = vmatpush.bf16.msra.mxu3 %v465_v16 }
  0x2e   :  { %333 = vmatpush.bf16.msra.mxu3 %v461_v19 }
  0x32   :  { %334 = vmatpush.bf16.msra.mxu3 %v457_v22 }
  0x36   :  { %335 = vmatpush.bf16.msra.mxu3 %v453_v28 }
  0x3a   :  { %336 = vmatpush.bf16.msra.mxu3 %v449_v31 }
  0x9d   :  { %v127_v34 = vpop.f32.mrf.mxu0 }
  0x9e   :  { %v128_v35 = vadd.f32 %v127_v34, %v70_v32  ;;  %v140_v36 = vpop.f32.mrf.mxu1  ;;  %v514_v32 = vld [vmem:[#allocation7 + $0x3] ss:$0 sm:$0xff] }
  0x9f   :  { %v141_v37 = vadd.f32 %v140_v36, %v71_v33 }
  0xa0   :  { %v144_v38 = vmax.f32 %v128_v35, 0.0 }
  0xa1   :  { %v145_v39 = vmax.f32 %v141_v37, 0.0 }
  0xa3   :  { %v508_v40 = vpack.i.bf16 %v145_v39, %v144_v38 }
  0xa5   :  { %509 = vrot.lane.b32.xlu0 %v508_v40, %s627_s0  ;;  %v129_v41 = vpop.f32.mrf.mxu0 }
  0xa6   :  { %v142_v42 = vpop.f32.mrf.mxu1 }
 0x117   :  { %v510_v49 = vpop.permute.xlu0 %509 }
 0x118   :  { %v512_v50 = vunpack.i.h.bf16 %v510_v49  ;;  %v511_v51 = vunpack.i.l.bf16 %v510_v49 }
 0x11a   :  { %v155_v52 = vmax.f32 %v145_v39, %v512_v50  ;;  %v150_v53 = vmax.f32 %v144_v38, %v511_v51  ;;  %v515_v38 = vld [vmem:[#allocation7 + $0x4] ss:$0 sm:$0xff] }
 0x11c   :  { %v156_v54 = vmax.f32 %v150_v53, %v155_v52 }
 0x11e   :  { %v157_v55 = vpack.c.bf16 %v156_v54, %v156_v54 }
 0x120   :  { %436 = vmatmul.msk.bf16.vlgmr.msra.gmra.mxu2 %vm114_vm0, %v157_v55 }
 0x1a3   :  { %v206_v57 = vpop.f32.mrf.mxu2 }
 0x1a4   :  { %v207_v58 = vadd.f32 %v513_v56, %v206_v57 }
 0x1a6   :  { %v210_v59 = vmax.f32 %v207_v58, 0.0 }
 0x1a8   :  { %212 = vrot.lane.b32.xlu0 %v210_v59, %s628_s2 }
 0x1ab   :  { %v208_v60 = vpop.f32.mrf.mxu2 }
 0x21a   :  { %v213_v3 = vpop.permute.xlu0 %212 }
 0x21b   :  { %v215_v4 = vmax.f32 %v210_v59, %v213_v3 }
 0x21d   :  { %217 = vrot.lane.b32.xlu1 %v215_v4, %s627_s0 }
 0x28f   :  { %v218_v23 = vpop.permute.xlu1 %217 }
 0x290   :  { %v220_v24 = vmax.f32 %v215_v4, %v218_v23 }
 0x292   :  { %v221_v25 = vpack.c.bf16 %v220_v24, %v220_v24 }
 0x294   :  { %445 = vmatmul.msk.bf16.vlgmr.msrb.gmra.mxu0 %vm242_vm1, %v221_v25 }
 0x311   :  { %v255_v33 = vpop.f32.mrf.mxu0 }
 0x312   :  { %v256_v34 = vadd.f32 %v514_v32, %v255_v33 }
 0x314   :  { %v259_v35 = vmax.f32 %v256_v34, 0.0 }
 0x316   :  { %v260_v36 = vpack.c.bf16 %v259_v35, %v259_v35 }
 0x318   :  { %337 = vmatmul.bf16.vlgmr.msra.gmra.mxu3 %v260_v36 }
 0x319   :  { %v257_v37 = vpop.f32.mrf.mxu0 }
 0x39b   :  { %v338_v39 = vpop.f32.mrf.mxu3 }
 0x39c   :  { %v339_v40 = vadd.f32 %v515_v38, %v338_v39 }
 0x39e   :  { %v343_v41 = vsel %vm342_vm2, %v339_v40, -inf }
 0x39f   :  { %344 = vmax.xlane.f32.xlu1 %v343_v41 }
 0x3a3   :  { %v340_v42 = vpop.f32.mrf.mxu3 }
 0x412   :  { %v345_v43 = vpop.xlane.xlu1 %344 }
 0x413   :  { %v346_v44 = vsub.f32 %v339_v40, %v345_v43 }
 0x415   :  { %v347_v45 = vmul.f32 1.442695, %v346_v44 }
 0x417   :  { %516 = vpow2.f32 %v347_v45 }
 0x41d   :  { %v517_v46 = vpop.eup %516 }
 0x41e   :  { %v349_v47 = vsel %vm342_vm2, %v517_v46, 0.0 }
 0x41f   :  { %350 = vadd.xlane.f32.xlu2 %v349_v47 }
 0x492   :  { %v351_v48 = vpop.xlane.xlu2 %350 }
 0x493   :  { %518 = vrcp.f32 %v351_v48  ;;  %v363_v52 = vand.u32 2147483648, %v351_v48  ;;  %v361_v54 = vand.u32 2147483647, %v351_v48  ;;  %vm357_vm4 = vweird.f32 %v351_v48 }
 0x495   :  { %v364_v56 = vor.u32 1.1754944e-38, %v363_v52  ;;  %vm362_vm6 = vcmp.eq.f32.partialorder %v361_v54, 8.507059e+37 }
 0x499   :  { %v519_v49 = vpop.eup %518 }
 0x49a   :  { %v353_v50 = vmul.f32 %v519_v49, %v351_v48  ;;  %vm358_vm3 = vweird.f32 %v519_v49 }
 0x49b   :  { %vm359_vm5 = vmor %vm357_vm4, %vm358_vm3 }
 0x49c   :  { %v354_v51 = vsub.f32 1.0, %v353_v50 }
 0x49e   :  { %v355_v53 = vmul.f32 %v519_v49, %v354_v51 }
 0x4a0   :  { %v356_v55 = vadd.f32 %v519_v49, %v355_v53 }
 0x4a2   :  { %v360_v57 = vsel %vm359_vm5, %v519_v49, %v356_v55 }
 0x4a3   :  { %v365_v58 = vsel %vm362_vm6, %v364_v56, %v360_v57 }
 0x4a4   :  { %v366_v59 = vmul.f32 %v517_v46, %v365_v58 }
 0x4a6   :  { %367 = vst [vmem:[#allocation8] sm:$0x3] %v366_v59 }
 0x4a7   :  { %378 = dma.vmem_to_hbm [thread:$0]  %s374_s29, 32, %s376_s5, [#allocation4]  }
 0x4a8   :  { %620 = dma.done.wait [#allocation4], 32  }
 0x4a9   :  { %621 = vsyncadd [#allocation4], 4294967264 }
 0x4aa   :  { %383 = vsyncpa [#allocation3], 1 }
 0x4ab   :  { %384 = vsyncpa [#allocation6], 1 }
 0x4ac   :  { %385 = vsyncpa [#allocation4], 1 }

// kernel: tpu_custom_call.1
= control target key start
LH: loop header
LB: loop body
LE: loop exit
PB: predicated region body
PF: predicated region fallthrough
CT: control target
= control target key end

     0   :  { %8 = vsyncpa [#allocation3], 0  ;;  %s667_s0 = inlined_call_operand.hbm [shape: bf16[2,64], index: 0, kind: input, shape index: {}]   ;;  %s668_s1 = inlined_call_operand.hbm [shape: bf16[128,640], index: 1, kind: input, shape index: {}]   ;;  %s669_s2 = inlined_call_operand.hbm [shape: f32[1,640], index: 2, kind: input, shape index: {}]   ;;  %s670_s3 = inlined_call_operand.hbm [shape: f32[2,128], index: 3, kind: output, shape index: {}]  }
   0x1   :  { %9 = vsyncpa [#allocation6], 0  ;;  %s26_s14 = sshll.u32 %s668_s1, 4  ;;  %s27_s14 = int_to_ptr.hbm [resolvable:$true] %s26_s14 }
   0x2   :  { %10 = vsyncpa [#allocation4], 0  ;;  %s622_s15 = smov [#allocation5]   ;;  %s16_s19 = sshll.u32 %s667_s0, 4  ;;  %s17_s19 = int_to_ptr.hbm [resolvable:$true] %s16_s19 }
   0x3   :  { %s28_s16 = sshll.u32 %s622_s15, 4  ;;  %s623_s20 = smov 320   ;;  %s29_s16 = int_to_ptr.vmem [resolvable:$true] %s28_s16 }
   0x4   :  { %s624_s21 = smov 20   ;;  %s625_s22 = smov [#allocation2]  }
   0x5   :  { %34 = dma.hbm_to_vmem [thread:$0]  %s27_s14, 5120, %s29_s16, [#allocation6], %s623_s20, %s623_s20, %s624_s21  }
   0x6   :  { %s18_s23 = sshll.u32 %s625_s22, 4  ;;  %s40_s26 = sshll.u32 %s669_s2, 4  ;;  %s19_s23 = int_to_ptr.vmem [resolvable:$true] %s18_s23  ;;  %s41_s26 = int_to_ptr.hbm [resolvable:$true] %s40_s26 }
   0x7   :  { %21 = dma.hbm_to_vmem [thread:$0]  %s17_s19, 16, %s19_s23, [#allocation3]  }
   0x8   :  { %s626_s1 = smov [#allocation7]  }
   0x9   :  { %s42_s27 = sshll.u32 %s626_s1, 4  ;;  %s43_s27 = int_to_ptr.vmem [resolvable:$true] %s42_s27 }
   0xa   :  { %45 = dma.hbm_to_vmem [thread:$0]  %s41_s26, 80, %s43_s27, [#allocation6]  }
   0xb   :  { %616 = dma.done.wait [#allocation3], 16  }
   0xc   :  { %617 = vsyncadd [#allocation3], 4294967280 }
   0xd   :  { %618 = dma.done.wait [#allocation6], 5200  }
   0xe   :  { %619 = vsyncadd [#allocation6], 4294962096  ;;  %v412_v0 = vld [vmem:[#allocation5 + $0x78] sm:$0xf]  ;;  %v485_v1 = vld [vmem:[#allocation5 + $0x88] sm:$0xf0] }
   0xf   :  { %v484_v2 = vld [vmem:[#allocation5 + $0x7c] sm:$0xf]  ;;  %v413_v3 = vor.u32 %v485_v1, %v412_v0  ;;  %v414_v4 = vld [vmem:[#allocation5 + $0x8c] sm:$0xf0]  ;;  %v483_v6 = vld [vmem:[#allocation5 + $0x60] sm:$0xf0] }
  0x10   :  { %v404_v5 = vld [vmem:[#allocation5 + $0x50] sm:$0xf]  ;;  %v417_v7 = vor.u32 %v484_v2, %v414_v4  ;;  %v482_v8 = vld [vmem:[#allocation5 + $0x54] sm:$0xf]  ;;  %v406_v9 = vld [vmem:[#allocation5 + $0x64] sm:$0xf0] }
  0x11   :  { %122 = vmatpush.bf16.msra.mxu0 %v413_v3  ;;  %v405_v10 = vor.u32 %v483_v6, %v404_v5  ;;  %v409_v11 = vor.u32 %v482_v8, %v406_v9  ;;  %v396_v12 = vld [vmem:[#allocation5 + $0x28] sm:$0xf]  ;;  %v481_v13 = vld [vmem:[#allocation5 + $0x38] sm:$0xf0]  ;;  %v480_v14 = vld [vmem:[#allocation5 + $0x2c] sm:$0xf] }
  0x12   :  { %135 = vmatpush.bf16.msra.mxu1 %v417_v7  ;;  %v398_v15 = vld [vmem:[#allocation5 + $0x3c] sm:$0xf0]  ;;  %v397_v16 = vor.u32 %v481_v13, %v396_v12  ;;  %v479_v19 = vld [vmem:[#allocation5 + $0x10] sm:$0xf0]  ;;  %v478_v20 = vld [vmem:[#allocation5 + $0x4] sm:$0xf] }
  0x13   :  { %v401_v17 = vor.u32 %v480_v14, %v398_v15  ;;  %v388_v18 = vld [vmem:[#allocation5] sm:$0xf]  ;;  %v390_v21 = vld [vmem:[#allocation5 + $0x14] sm:$0xf0]  ;;  %v59_v24 = vld [vmem:[#allocation2] sm:$0x1] }
  0x14   :  { %v389_v22 = vor.u32 %v479_v19, %v388_v18  ;;  %v393_v23 = vor.u32 %v478_v20, %v390_v21  ;;  %vm114_vm0 = vcmask 523264   ;;  %v434_v25 = vld [vmem:[#allocation5 + $0x80] sm:$0xf]  ;;  %v489_v26 = vld [vmem:[#allocation5 + $0x90] sm:$0xf0]  ;;  %s627_s0 = smov 64  }
  0x15   :  { %123 = vmatpush.bf16.msra.mxu0 %v405_v10  ;;  %v430_v27 = vld [vmem:[#allocation5 + $0x58] sm:$0xf]  ;;  %v435_v28 = vor.u32 %v489_v26, %v434_v25  ;;  %v488_v29 = vld [vmem:[#allocation5 + $0x68] sm:$0xf0]  ;;  %v68_v31 = vld [vmem:[#allocation7] sm:$0x3] }
  0x16   :  { %136 = vmatpush.bf16.msra.mxu1 %v409_v11  ;;  %v431_v30 = vor.u32 %v488_v29, %v430_v27  ;;  %v70_v32 = vperm.slane %v68_v31, 0  ;;  %v71_v33 = vperm.slane %v68_v31, 1  ;;  %v426_v43 = vld [vmem:[#allocation5 + $0x30] sm:$0xf]  ;;  %v487_v44 = vld [vmem:[#allocation5 + $0x40] sm:$0xf0] }
  0x17   :  { %201 = vmatpush.bf16.msra.mxu2 %v435_v28  ;;  %v427_v45 = vor.u32 %v487_v44, %v426_v43  ;;  %v422_v46 = vld [vmem:[#allocation5 + $0x8] sm:$0xf]  ;;  %v486_v47 = vld [vmem:[#allocation5 + $0x18] sm:$0xf0]  ;;  %v513_v56 = vld [vmem:[#allocation7 + $0x2] ss:$0 sm:$0xff] }
  0x18   :  { %v423_v48 = vor.u32 %v486_v47, %v422_v46  ;;  %s628_s2 = smov 96   ;;  %v443_v61 = vld [vmem:[#allocation5 + $0x34] sm:$0xf]  ;;  %v491_v62 = vld [vmem:[#allocation5 + $0x44] sm:$0xf0]  ;;  %vm242_vm1 = vcmask 261120  }
  0x19   :  { %124 = vmatpush.bf16.msra.mxu0 %v397_v16  ;;  %v439_v63 = vld [vmem:[#allocation5 + $0xc] sm:$0xf]  ;;  %v444_v0 = vor.u32 %v491_v62, %v443_v61  ;;  %v490_v1 = vld [vmem:[#allocation5 + $0x1c] sm:$0xf0]  ;;  %v476_v5 = vld [vmem:[#allocation5 + $0x128] sm:$0xf] }
  0x1a   :  { %137 = vmatpush.bf16.msra.mxu1 %v401_v17  ;;  %v440_v2 = vor.u32 %v490_v1, %v439_v63  ;;  %v499_v6 = vld [vmem:[#allocation5 + $0x138] sm:$0xf0]  ;;  %v472_v7 = vld [vmem:[#allocation5 + $0x100] sm:$0xf]  ;;  %v498_v9 = vld [vmem:[#allocation5 + $0x110] sm:$0xf0] }
  0x1b   :  { %202 = vmatpush.bf16.msra.mxu2 %v431_v30  ;;  %v477_v8 = vor.u32 %v499_v6, %v476_v5  ;;  %v473_v10 = vor.u32 %v498_v9, %v472_v7  ;;  %v468_v11 = vld [vmem:[#allocation5 + $0xd8] sm:$0xf]  ;;  %v497_v12 = vld [vmem:[#allocation5 + $0xe8] sm:$0xf0]  ;;  %v464_v14 = vld [vmem:[#allocation5 + $0xb0] sm:$0xf] }
  0x1c   :  { %v469_v13 = vor.u32 %v497_v12, %v468_v11  ;;  %v496_v15 = vld [vmem:[#allocation5 + $0xc0] sm:$0xf0]  ;;  %v460_v17 = vld [vmem:[#allocation5 + $0x88] sm:$0xf]  ;;  %v495_v18 = vld [vmem:[#allocation5 + $0x98] sm:$0xf0] }
  0x1d   :  { %125 = vmatpush.bf16.msra.mxu0 %v389_v22  ;;  %329 = vmatpush.bf16.msra.mxu3 %v477_v8  ;;  %v465_v16 = vor.u32 %v496_v15, %v464_v14  ;;  %v461_v19 = vor.u32 %v495_v18, %v460_v17  ;;  %v456_v20 = vld [vmem:[#allocation5 + $0x60] sm:$0xf]  ;;  %v494_v21 = vld [vmem:[#allocation5 + $0x70] sm:$0xf0]  ;;  %v452_v26 = vld [vmem:[#allocation5 + $0x38] sm:$0xf] }
  0x1e   :  { %138 = vmatpush.bf16.msra.mxu1 %v393_v23  ;;  %v457_v22 = vor.u32 %v494_v21, %v456_v20  ;;  %v493_v27 = vld [vmem:[#allocation5 + $0x48] sm:$0xf0]  ;;  %v448_v29 = vld [vmem:[#allocation5 + $0x10] sm:$0xf]  ;;  %v492_v30 = vld [vmem:[#allocation5 + $0x20] sm:$0xf0] }
  0x1f   :  { %203 = vmatpush.bf16.msra.mxu2 %v427_v45  ;;  %v453_v28 = vor.u32 %v493_v27, %v452_v26  ;;  %v449_v31 = vor.u32 %v492_v30, %v448_v29  ;;  %vm342_vm2 = vcmask 1041408   ;;  %s629_s28 = smov [#allocation8]   ;;  %s375_s5 = sshll.u32 %s670_s3, 4  ;;  %s376_s5 = int_to_ptr.hbm [resolvable:$true] %s375_s5 }
  0x20   :  { %418 = vmatmul.msk.bf16.vlgmr.msra.gmra.mxu0 %vm114_vm0, %v59_v24  ;;  %s373_s29 = sshll.u32 %s629_s28, 4  ;;  %s374_s29 = int_to_ptr.vmem [resolvable:$true] %s373_s29 }
  0x21   :  { %419 = vmatmul.msk.bf16.vlgmr.msra.gmra.mxu1 %vm114_vm0, %v59_v24  ;;  %252 = vmatpush.bf16.msrb.mxu0 %v444_v0 }
  0x22   :  { %330 = vmatpush.bf16.msra.mxu3 %v473_v10 }
  0x23   :  { %204 = vmatpush.bf16.msra.mxu2 %v423_v48 }
  0x25   :  { %253 = vmatpush.bf16.msrb.mxu0 %v440_v2 }
  0x26   :  { %331 = vmatpush.bf16.msra.mxu3 %v469_v13 }
  0x2a   :  { %332 = vmatpush.bf16.msra.mxu3 %v465_v16 }
  0x2e   :  { %333 = vmatpush.bf16.msra.mxu3 %v461_v19 }
  0x32   :  { %334 = vmatpush.bf16.msra.mxu3 %v457_v22 }
  0x36   :  { %335 = vmatpush.bf16.msra.mxu3 %v453_v28 }
  0x3a   :  { %336 = vmatpush.bf16.msra.mxu3 %v449_v31 }
  0x9d   :  { %v127_v34 = vpop.f32.mrf.mxu0 }
  0x9e   :  { %v128_v35 = vadd.f32 %v127_v34, %v70_v32  ;;  %v140_v36 = vpop.f32.mrf.mxu1  ;;  %v514_v32 = vld [vmem:[#allocation7 + $0x3] ss:$0 sm:$0xff] }
  0x9f   :  { %v141_v37 = vadd.f32 %v140_v36, %v71_v33 }
  0xa0   :  { %v144_v38 = vmax.f32 %v128_v35, 0.0 }
  0xa1   :  { %v145_v39 = vmax.f32 %v141_v37, 0.0 }
  0xa3   :  { %v508_v40 = vpack.i.bf16 %v145_v39, %v144_v38 }
  0xa5   :  { %509 = vrot.lane.b32.xlu0 %v508_v40, %s627_s0  ;;  %v129_v41 = vpop.f32.mrf.mxu0 }
  0xa6   :  { %v142_v42 = vpop.f32.mrf.mxu1 }
 0x117   :  { %v510_v49 = vpop.permute.xlu0 %509 }
 0x118   :  { %v512_v50 = vunpack.i.h.bf16 %v510_v49  ;;  %v511_v51 = vunpack.i.l.bf16 %v510_v49 }
 0x11a   :  { %v155_v52 = vmax.f32 %v145_v39, %v512_v50  ;;  %v150_v53 = vmax.f32 %v144_v38, %v511_v51  ;;  %v515_v38 = vld [vmem:[#allocation7 + $0x4] ss:$0 sm:$0xff] }
 0x11c   :  { %v156_v54 = vmax.f32 %v150_v53, %v155_v52 }
 0x11e   :  { %v157_v55 = vpack.c.bf16 %v156_v54, %v156_v54 }
 0x120   :  { %436 = vmatmul.msk.bf16.vlgmr.msra.gmra.mxu2 %vm114_vm0, %v157_v55 }
 0x1a3   :  { %v206_v57 = vpop.f32.mrf.mxu2 }
 0x1a4   :  { %v207_v58 = vadd.f32 %v513_v56, %v206_v57 }
 0x1a6   :  { %v210_v59 = vmax.f32 %v207_v58, 0.0 }
 0x1a8   :  { %212 = vrot.lane.b32.xlu0 %v210_v59, %s628_s2 }
 0x1ab   :  { %v208_v60 = vpop.f32.mrf.mxu2 }
 0x21a   :  { %v213_v3 = vpop.permute.xlu0 %212 }
 0x21b   :  { %v215_v4 = vmax.f32 %v210_v59, %v213_v3 }
 0x21d   :  { %217 = vrot.lane.b32.xlu1 %v215_v4, %s627_s0 }
 0x28f   :  { %v218_v23 = vpop.permute.xlu1 %217 }
 0x290   :  { %v220_v24 = vmax.f32 %v215_v4, %v218_v23 }
 0x292   :  { %v221_v25 = vpack.c.bf16 %v220_v24, %v220_v24 }
 0x294   :  { %445 = vmatmul.msk.bf16.vlgmr.msrb.gmra.mxu0 %vm242_vm1, %v221_v25 }
 0x311   :  { %v255_v33 = vpop.f32.mrf.mxu0 }
 0x312   :  { %v256_v34 = vadd.f32 %v514_v32, %v255_v33 }
 0x314   :  { %v259_v35 = vmax.f32 %v256_v34, 0.0 }
 0x316   :  { %v260_v36 = vpack.c.bf16 %v259_v35, %v259_v35 }
 0x318   :  { %337 = vmatmul.bf16.vlgmr.msra.gmra.mxu3 %v260_v36 }
 0x319   :  { %v257_v37 = vpop.f32.mrf.mxu0 }
 0x39b   :  { %v338_v39 = vpop.f32.mrf.mxu3 }
 0x39c   :  { %v339_v40 = vadd.f32 %v515_v38, %v338_v39 }
 0x39e   :  { %v343_v41 = vsel %vm342_vm2, %v339_v40, -inf }
 0x39f   :  { %344 = vmax.xlane.f32.xlu1 %v343_v41 }
 0x3a3   :  { %v340_v42 = vpop.f32.mrf.mxu3 }
 0x412   :  { %v345_v43 = vpop.xlane.xlu1 %344 }
 0x413   :  { %v346_v44 = vsub.f32 %v339_v40, %v345_v43 }
 0x415   :  { %v347_v45 = vmul.f32 1.442695, %v346_v44 }
 0x417   :  { %516 = vpow2.f32 %v347_v45 }
 0x41d   :  { %v517_v46 = vpop.eup %516 }
 0x41e   :  { %v349_v47 = vsel %vm342_vm2, %v517_v46, 0.0 }
 0x41f   :  { %350 = vadd.xlane.f32.xlu2 %v349_v47 }
 0x492   :  { %v351_v48 = vpop.xlane.xlu2 %350 }
 0x493   :  { %518 = vrcp.f32 %v351_v48  ;;  %v363_v52 = vand.u32 2147483648, %v351_v48  ;;  %v361_v54 = vand.u32 2147483647, %v351_v48  ;;  %vm357_vm4 = vweird.f32 %v351_v48 }
 0x495   :  { %v364_v56 = vor.u32 1.1754944e-38, %v363_v52  ;;  %vm362_vm6 = vcmp.eq.f32.partialorder %v361_v54, 8.507059e+37 }
 0x499   :  { %v519_v49 = vpop.eup %518 }
 0x49a   :  { %v353_v50 = vmul.f32 %v519_v49, %v351_v48  ;;  %vm358_vm3 = vweird.f32 %v519_v49 }
 0x49b   :  { %vm359_vm5 = vmor %vm357_vm4, %vm358_vm3 }
 0x49c   :  { %v354_v51 = vsub.f32 1.0, %v353_v50 }
 0x49e   :  { %v355_v53 = vmul.f32 %v519_v49, %v354_v51 }
 0x4a0   :  { %v356_v55 = vadd.f32 %v519_v49, %v355_v53 }
 0x4a2   :  { %v360_v57 = vsel %vm359_vm5, %v519_v49, %v356_v55 }
 0x4a3   :  { %v365_v58 = vsel %vm362_vm6, %v364_v56, %v360_v57 }
 0x4a4   :  { %v366_v59 = vmul.f32 %v517_v46, %v365_v58 }
 0x4a6   :  { %367 = vst [vmem:[#allocation8] sm:$0x3] %v366_v59 }
 0x4a7   :  { %378 = dma.vmem_to_hbm [thread:$0]  %s374_s29, 32, %s376_s5, [#allocation4]  }
 0x4a8   :  { %620 = dma.done.wait [#allocation4], 32  }
 0x4a9   :  { %621 = vsyncadd [#allocation4], 4294967264 }
 0x4aa   :  { %383 = vsyncpa [#allocation3], 1 }
 0x4ab   :  { %384 = vsyncpa [#allocation6], 1 }
 0x4ac   :  { %385 = vsyncpa [#allocation4], 1 }

</bundles_post_ra>
